<compile_context>
chip_gen: v5e
topology: v5e:2x2
jax: 0.10.0
libtpu: 0.0.40
codegen_flags: <defaults>
</compile_context>

<pallas_src>
import jax
import jax.numpy as jnp
from jax.experimental import pallas as pl
from jax.experimental.pallas import tpu as pltpu


def _round_up(x, m):
    return ((x + m - 1) // m) * m


# ----------------------------------------------------------------------------
# Pallas kernel:
#   h = tail_block @ W1_tail + q_proj[b]        (q_proj already includes b1
#                                                and the query-half of W1)
#   h = LeakyReLU(h, 0.01)
#   p = sigmoid(h @ (w2[:,0]-w2[:,1]) + (b2[0]-b2[1]))   == softmax(...)[...,0]
#   out[..., 0] = p ; out[..., 1] = 1 - p
# ----------------------------------------------------------------------------
def _weight_mlp_kernel(tail_ref, qproj_ref, w1t_ref, w2d_ref, b2d_ref, o_ref):
    t = tail_ref[0, :, :]                                    # (TILE_N, Dt)
    h = jnp.dot(t, w1t_ref[...], preferred_element_type=jnp.float32)
    h = h + qproj_ref[0, :, :]                               # (TILE_N, H) + (1, H)
    h = jnp.where(h > 0, h, 0.01 * h)                        # LeakyReLU (torch default)
    diff = jnp.dot(h, w2d_ref[...], preferred_element_type=jnp.float32)
    diff = diff + b2d_ref[...]                               # (TILE_N, 1)
    p = 1.0 / (1.0 + jnp.exp(-diff))                         # softmax([y0,y1])[0]
    out = jnp.concatenate((p, 1.0 - p), axis=-1)             # (TILE_N, 2)
    o_ref[0, :, :] = out.astype(o_ref.dtype)


def weight_mlp_softmax(tail_cat, q_proj, w1_tail, w2_diff, b2_diff,
                       *, tile_n=2048, compute_dtype=jnp.float32,
                       vmem_limit_bytes=32 * 1024 * 1024):
    """
    tail_cat : (B, N, Dt)  per-row (tail-dependent) features
    q_proj   : (B, H)      q_cat @ W1[:Dq] + b1  (constant across N)
    w1_tail  : (Dt, H)     tail half of the first linear layer
    w2_diff  : (H,)        w2[:, 0] - w2[:, 1]
    b2_diff  : ()          b2[0]  - b2[1]
    returns  : (B, N, 2)   softmax weights
    """
    B, N, Dt = tail_cat.shape
    H = w1_tail.shape[1]

    tile_n = min(tile_n, _round_up(N, 8))      # multiple of 8 (sublane constraint)
    n_pad = _round_up(N, tile_n)
    if n_pad != N:
        tail_cat = jnp.pad(tail_cat, ((0, 0), (0, n_pad - N), (0, 0)))

    tail_cat = tail_cat.astype(compute_dtype)
    w1_tail = w1_tail.astype(compute_dtype)
    q_proj = q_proj.reshape(B, 1, H).astype(jnp.float32)
    w2_diff = w2_diff.reshape(H, 1).astype(jnp.float32)
    b2_diff = jnp.asarray(b2_diff, jnp.float32).reshape(1, 1)

    grid = (B, n_pad // tile_n)
    out = pl.pallas_call(
        _weight_mlp_kernel,
        out_shape=jax.ShapeDtypeStruct((B, n_pad, 2), jnp.float32),
        grid_spec=pltpu.PrefetchScalarGridSpec(
            num_scalar_prefetch=0,
            grid=grid,
            in_specs=[
                pl.BlockSpec((1, tile_n, Dt), lambda b, j: (b, j, 0)),   # streamed rows
                pl.BlockSpec((1, 1, H), lambda b, j: (b, 0, 0)),         # per-batch q_proj
                pl.BlockSpec((Dt, H), lambda b, j: (0, 0)),              # resident weights
                pl.BlockSpec((H, 1), lambda b, j: (0, 0)),
                pl.BlockSpec((1, 1), lambda b, j: (0, 0)),
            ],
            out_specs=pl.BlockSpec((1, tile_n, 2), lambda b, j: (b, j, 0)),
        ),
        compiler_params=pltpu.CompilerParams(
            dimension_semantics=("parallel", "parallel"),
            vmem_limit_bytes=vmem_limit_bytes,
        ),
    )(tail_cat, q_proj, w1_tail, w2_diff, b2_diff)
    return out[:, :N, :]


# ----------------------------------------------------------------------------
# weight_learnerv3 forward (JAX glue + Pallas hot path)
# ----------------------------------------------------------------------------
def weight_learnerv3_forward(params, query, tail, data, *,
                             compute_dtype=jnp.float32, tile_n=2048):
    """
    query : (B, 1, entity_dim)     f32
    tail  : (B, N, entity_dim)     f32   (N = 1 + negative_sample_size)
    data  : (positive (B,3) int32, negative (B, N-1) int32)
    returns weights (B, N, 2)
    """
    positive, negative = data
    entity_emb = params["entity_embedding"]        # (nentity, 32)
    relation_emb = params["relation_embedding"]    # (nrelation, 32)

    B, neg = negative.shape

    # EntityEmbeddingExtract / RelationEmbeddingExtract (gather glue in JAX)
    head_ = entity_emb[positive[:, 0]]                                  # (B, 32)
    relation_ = relation_emb[positive[:, 1]]                            # (B, 32)
    pos_tail = entity_emb[positive[:, 2]][:, None, :]                   # (B, 1, 32)
    neg_tail = entity_emb[negative.reshape(-1)].reshape(B, neg, -1)     # (B, neg, 32)
    tail_ = jnp.concatenate((pos_tail, neg_tail), axis=1)               # (B, neg+1, 32)

    # Query half of `combined` is constant across N -> project it once per
    # batch element (tiny (B, Dq) x (Dq, H) matmul, includes b1).
    q_cat = jnp.concatenate((query[:, 0, :], head_, relation_), axis=-1)  # (B, Dq)
    Dq = q_cat.shape[-1]
    w1, b1, w2, b2 = params["w1"], params["b1"], params["w2"], params["b2"]
    q_proj = q_cat.astype(jnp.float32) @ w1[:Dq, :] + b1                  # (B, H)

    # Row-dependent half.
    tail_cat = jnp.concatenate((tail, tail_), axis=-1).astype(jnp.float32)  # (B, N, Dt)
    w1_tail = w1[Dq:, :]
    w2_diff = w2[:, 0] - w2[:, 1]
    b2_diff = b2[0] - b2[1]

    return weight_mlp_softmax(tail_cat, q_proj, w1_tail, w2_diff, b2_diff,
                              tile_n=tile_n, compute_dtype=compute_dtype)


# ----------------------------------------------------------------------------
# Deterministic parameter construction (mirrors module __init__ shapes)
# ----------------------------------------------------------------------------
def init_params(key, nentity, nrelation, entity_dim, relation_dim, layer_mul=2):
    d_in = 4 * entity_dim + relation_dim
    d_hid = d_in * layer_mul
    ks = jax.random.split(key, 6)

    def xavier(k, shape):
        fan_in, fan_out = shape[1], shape[0]
        bound = (6.0 / (fan_in + fan_out)) ** 0.5
        return jax.random.uniform(k, shape, jnp.float32, -bound, bound)

    def linear(k, fin, fout):
        kw, kb = jax.random.split(k)
        bound = 1.0 / (fin ** 0.5)
        w = jax.random.uniform(kw, (fin, fout), jnp.float32, -bound, bound)
        b = jax.random.uniform(kb, (fout,), jnp.float32, -bound, bound)
        return w, b

    w1, b1 = linear(ks[2], d_in, d_hid)
    w2, b2 = linear(ks[3], d_hid, 2)
    return {
        "entity_embedding": xavier(ks[0], (nentity, 32)),
        "relation_embedding": xavier(ks[1], (nrelation, 32)),
        "w1": w1, "b1": b1, "w2": w2, "b2": b2,
    }


# ----------------------------------------------------------------------------
def _reference_forward(params, query, tail, data):
    """Pure-JAX reference of the same forward pass (for correctness check)."""
    positive, negative = data
    entity_emb = params["entity_embedding"]
    relation_emb = params["relation_embedding"]
    B, neg = negative.shape
    head_ = entity_emb[positive[:, 0]][:, None, :]
    relation_ = relation_emb[positive[:, 1]][:, None, :]
    pos_tail = entity_emb[positive[:, 2]][:, None, :]
    neg_tail = entity_emb[negative.reshape(-1)].reshape(B, neg, -1)
    tail_ = jnp.concatenate((pos_tail, neg_tail), axis=1)
    N = tail.shape[1]
    q = jnp.broadcast_to(jnp.concatenate((query, head_, relation_), axis=-1),
                         (B, N, query.shape[-1] + 64))
    t = jnp.concatenate((tail, tail_), axis=-1)
    c = jnp.concatenate((q, t), axis=-1)
    h = c @ params["w1"] + params["b1"]
    h = jnp.where(h > 0, h, 0.01 * h)
    y = h @ params["w2"] + params["b2"]
    return jax.nn.softmax(y, axis=2)


if __name__ == "__main__":
    # args: target_dim=32, entity_mul=1, relation_mul=1  ->  entity_dim=relation_dim=32
    # (required so 4*entity_dim + relation_dim matches the hard-coded 32-wide
    #  embedding tables:  Dq + Dt + 3*32 = 4*32 + 32)
    nentity, nrelation = 20, 7
    entity_dim = relation_dim = 32
    B, neg = 2, 4
    N = neg + 1

    key = jax.random.PRNGKey(0)
    kp, kq, kt, kpos, kneg = jax.random.split(key, 5)

    params = init_params(kp, nentity, nrelation, entity_dim, relation_dim)

    query = jax.random.normal(kq, (B, 1, entity_dim), jnp.float32)
    tail = jax.random.normal(kt, (B, N, entity_dim), jnp.float32)
    positive = jnp.stack([
        jax.random.randint(jax.random.fold_in(kpos, 0), (B,), 0, nentity),
        jax.random.randint(jax.random.fold_in(kpos, 1), (B,), 0, nrelation),
        jax.random.randint(jax.random.fold_in(kpos, 2), (B,), 0, nentity),
    ], axis=1).astype(jnp.int32)                                   # (B, 3)
    negative = jax.random.randint(kneg, (B, neg), 0, nentity).astype(jnp.int32)

    data = (positive, negative)

    weights = weight_learnerv3_forward(params, query, tail, data)
    weights = jax.block_until_ready(weights)

    ref = _reference_forward(params, query, tail, data)
    assert weights.shape == (B, N, 2)
    assert jnp.allclose(weights, ref, atol=1e-5, rtol=1e-5)
    assert jnp.allclose(jnp.sum(weights, axis=-1), 1.0, atol=1e-5)

    # TODO(synk): forward2 (PT1/PT2/fusion embedding MLP_) not exercised by forward(); omitted.
    print("KERNEL_OK")
</pallas_src>

<mosaic_0001>
module attributes {stable_mosaic.version = 11 : i64} {
  func.func @_weight_mlp_kernel(%arg0: i32, %arg1: i32, %arg2: memref<1x8x64xf32, #tpu.memory_space<vmem>>, %arg3: memref<1x1x320xf32, #tpu.memory_space<vmem>>, %arg4: memref<64x320xf32, #tpu.memory_space<vmem>>, %arg5: memref<320x1xf32, #tpu.memory_space<vmem>>, %arg6: memref<1x1xf32, #tpu.memory_space<vmem>>, %arg7: memref<1x8x2xf32, #tpu.memory_space<vmem>>) attributes {dimension_semantics = [#tpu.dimension_semantics<parallel>, #tpu.dimension_semantics<parallel>], iteration_bounds = array<i64: 2, 1>, scalar_prefetch = 0 : i64, scratch_operands = 0 : i64, tpu.core_type = #tpu.core_type<tc>, window_params = [{transform_indices = @transform_0, window_bounds = array<i64: 1, 8, 64>}, {transform_indices = @transform_1, window_bounds = array<i64: 1, 1, 320>}, {pipeline_mode = #tpu.pipeline_mode<synchronous>, transform_indices = @transform_2, window_bounds = array<i64: 64, 320>}, {pipeline_mode = #tpu.pipeline_mode<synchronous>, transform_indices = @transform_3, window_bounds = array<i64: 320, 1>}, {pipeline_mode = #tpu.pipeline_mode<synchronous>, transform_indices = @transform_4, window_bounds = array<i64: 1, 1>}, {transform_indices = @transform_5, window_bounds = array<i64: 1, 8, 2>}]} {
    %c0 = arith.constant 0 : index
    %c0_0 = arith.constant 0 : index
    %c0_1 = arith.constant 0 : index
    %0 = vector.load %arg2[%c0, %c0_0, %c0_1] : memref<1x8x64xf32, #tpu.memory_space<vmem>>, vector<1x8x64xf32>
    %1 = vector.shape_cast %0 : vector<1x8x64xf32> to vector<8x64xf32>
    %c0_2 = arith.constant 0 : index
    %c0_3 = arith.constant 0 : index
    %2 = vector.load %arg4[%c0_2, %c0_3] : memref<64x320xf32, #tpu.memory_space<vmem>>, vector<64x320xf32>
    %cst = arith.constant dense<0.000000e+00> : vector<8x320xf32>
    %3 = tpu.matmul %1, %2, %cst {dimension_numbers = #tpu.dot_dimension_numbers<[1], [0], [0], [1], [0, 0, 1, 1], [], []>} : vector<8x64xf32>, vector<64x320xf32>, vector<8x320xf32> -> vector<8x320xf32>
    %c0_4 = arith.constant 0 : index
    %c0_5 = arith.constant 0 : index
    %c0_6 = arith.constant 0 : index
    %4 = vector.load %arg3[%c0_4, %c0_5, %c0_6] : memref<1x1x320xf32, #tpu.memory_space<vmem>>, vector<1x1x320xf32>
    %5 = vector.shape_cast %4 : vector<1x1x320xf32> to vector<1x320xf32>
    %6 = vector.broadcast %5 : vector<1x320xf32> to vector<8x320xf32>
    %7 = arith.addf %3, %6 : vector<8x320xf32>
    %cst_7 = arith.constant 0.000000e+00 : f32
    %8 = vector.broadcast %cst_7 : f32 to vector<8x320xf32>
    %9 = arith.cmpf ogt, %7, %8 : vector<8x320xf32>
    %cst_8 = arith.constant 0.00999999977 : f32
    %10 = vector.broadcast %cst_8 : f32 to vector<8x320xf32>
    %11 = arith.mulf %10, %7 : vector<8x320xf32>
    %12 = arith.select %9, %7, %11 : vector<8x320xi1>, vector<8x320xf32>
    %c0_9 = arith.constant 0 : index
    %c0_10 = arith.constant 0 : index
    %13 = vector.load %arg5[%c0_9, %c0_10] : memref<320x1xf32, #tpu.memory_space<vmem>>, vector<320x1xf32>
    %cst_11 = arith.constant dense<0.000000e+00> : vector<8x1xf32>
    %14 = tpu.matmul %12, %13, %cst_11 {dimension_numbers = #tpu.dot_dimension_numbers<[1], [0], [0], [1], [0, 0, 1, 1], [], []>} : vector<8x320xf32>, vector<320x1xf32>, vector<8x1xf32> -> vector<8x1xf32>
    %c0_12 = arith.constant 0 : index
    %c0_13 = arith.constant 0 : index
    %15 = vector.load %arg6[%c0_12, %c0_13] : memref<1x1xf32, #tpu.memory_space<vmem>>, vector<1x1xf32>
    %16 = vector.broadcast %15 : vector<1x1xf32> to vector<8x1xf32>
    %17 = arith.addf %14, %16 : vector<8x1xf32>
    %cst_14 = arith.constant 0.000000e+00 : f32
    %18 = vector.broadcast %cst_14 : f32 to vector<8x1xf32>
    %19 = arith.subf %18, %17 : vector<8x1xf32>
    %20 = math.exp %19 : vector<8x1xf32>
    %cst_15 = arith.constant 1.000000e+00 : f32
    %21 = vector.broadcast %cst_15 : f32 to vector<8x1xf32>
    %22 = arith.addf %21, %20 : vector<8x1xf32>
    %cst_16 = arith.constant 1.000000e+00 : f32
    %23 = vector.broadcast %cst_16 : f32 to vector<8x1xf32>
    %24 = arith.divf %23, %22 : vector<8x1xf32>
    %cst_17 = arith.constant 1.000000e+00 : f32
    %25 = vector.broadcast %cst_17 : f32 to vector<8x1xf32>
    %26 = arith.subf %25, %24 : vector<8x1xf32>
    %27 = tpu.concatenate %24, %26 in 1 : vector<8x1xf32>, vector<8x1xf32> -> vector<8x2xf32>
    %c0_18 = arith.constant 0 : index
    %c0_19 = arith.constant 0 : index
    %c0_20 = arith.constant 0 : index
    %28 = vector.load %arg7[%c0_18, %c0_19, %c0_20] : memref<1x8x2xf32, #tpu.memory_space<vmem>>, vector<1x8x2xf32>
    %29 = vector.shape_cast %28 : vector<1x8x2xf32> to vector<8x2xf32>
    %30 = vector.shape_cast %27 : vector<8x2xf32> to vector<1x8x2xf32>
    tpu.vector_store %arg7[%c0_18, %c0_19, %c0_20], %30 {strides = array<i32>} : memref<1x8x2xf32, #tpu.memory_space<vmem>>, vector<1x8x2xf32>,
    return
  }
  func.func @transform_0(%arg0: i32, %arg1: i32) -> (i32, i32, i32) {
    %c0_i32 = arith.constant 0 : i32
    %c0_i32_0 = arith.constant 0 : i32
    return %arg0, %arg1, %c0_i32 : i32, i32, i32
  }
  func.func @transform_1(%arg0: i32, %arg1: i32) -> (i32, i32, i32) {
    %c0_i32 = arith.constant 0 : i32
    %c0_i32_0 = arith.constant 0 : i32
    %c0_i32_1 = arith.constant 0 : i32
    return %arg0, %c0_i32, %c0_i32_0 : i32, i32, i32
  }
  func.func @transform_2(%arg0: i32, %arg1: i32) -> (i32, i32) {
    %c0_i32 = arith.constant 0 : i32
    %c0_i32_0 = arith.constant 0 : i32
    %c0_i32_1 = arith.constant 0 : i32
    return %c0_i32, %c0_i32_0 : i32, i32
  }
  func.func @transform_3(%arg0: i32, %arg1: i32) -> (i32, i32) {
    %c0_i32 = arith.constant 0 : i32
    %c0_i32_0 = arith.constant 0 : i32
    %c0_i32_1 = arith.constant 0 : i32
    return %c0_i32, %c0_i32_0 : i32, i32
  }
  func.func @transform_4(%arg0: i32, %arg1: i32) -> (i32, i32) {
    %c0_i32 = arith.constant 0 : i32
    %c0_i32_0 = arith.constant 0 : i32
    %c0_i32_1 = arith.constant 0 : i32
    return %c0_i32, %c0_i32_0 : i32, i32
  }
  func.func @transform_5(%arg0: i32, %arg1: i32) -> (i32, i32, i32) {
    %c0_i32 = arith.constant 0 : i32
    %c0_i32_0 = arith.constant 0 : i32
    return %arg0, %arg1, %c0_i32 : i32, i32, i32
  }
}

</mosaic_0001>

<bundles_post_ra>
// kernel: tpu_custom_call.1
= control target key start
LH: loop header
LB: loop body
LE: loop exit
PB: predicated region body
PF: predicated region fallthrough
CT: control target
= control target key end

     0   :  { %s699_s20 = smov 0   ;;  %s701_s21 = smov 0   ;;  %s939_s0 = inlined_call_operand.vmem [shape: f32[2,8,64], index: 0, kind: input, shape index: {}]   ;;  %s940_s1 = inlined_call_operand.vmem [shape: f32[2,1,320], index: 1, kind: input, shape index: {}]   ;;  %s941_s2 = inlined_call_operand.vmem [shape: f32[64,320], index: 2, kind: input, shape index: {}]   ;;  %s942_s3 = inlined_call_operand.vmem [shape: f32[320,1], index: 3, kind: input, shape index: {}]   ;;  %s943_s4 = inlined_call_operand.<no memory space> [shape: f32[1,1], index: 4, kind: input, shape index: {}]   ;;  %s944_s5 = inlined_call_operand.vmem [shape: f32[2,8,2], index: 5, kind: output, shape index: {}]  }
   0x1   :  { %v10_v0 = vstv %s943_s4  ;;  %s703_s22 = smov 0  }
   0x2   :  { %11 = vst [vmem:[#allocation2] sm:$0x1] %v10_v0 }
   0x3 LB: > { %s29_s4 = sadd.s32 1, %s659_s21  ;;  %p601_p0 = scmp.ge.s32.totalorder %s663_s22, 1  ;;  %s663_s22 = sphi %s703_s22, %s17_s22   ;;  %s659_s21 = sphi %s701_s21, %s946_s21   ;;  %s655_s20 = sphi %s699_s20, %s945_s20  }
   0x4   : > { %p31_p1 = scmp.ge.s32.totalorder %s29_s4, 2  ;;  %p216_p2 = scmp.lt.s32.totalorder %s663_s22, 3 }
   0x6   : > { %s948_s4 = smov (%p31_p1, %s29_s4), 0  ;;  %p217_p3 = pnand %p601_p0, %p216_p2 }
   0x7   : > { %p252_p4 = scmp.lt.s32.totalorder (!%p217_p3), %s655_s20, 1  ;;  %s665_s7 = smov (!%p217_p3), 1  }
   0x8   : > { %220 = sbr.rel (%p217_p3) target bundleno = 459 (0x1cb), region = 40 }
   0xd   : > { %v292_v1 = vld [vmem:[%s941_s2 + $0xa8] sm:$0xff]  ;;  %v289_v2 = vld [vmem:[%s941_s2 + $0x90] sm:$0xff]  ;;  %v286_v3 = vld [vmem:[%s941_s2 + $0x78] sm:$0xff]  ;;  %s950_s20 = smov (!%p252_p4, %s655_s20), 1  ;;  %vm303_vm0 = vcmask 523264   ;;  %vm507_vm8 = vcmask 7168  }
   0xe   : > { %315 = vmatpush.msra.mxu2 %v292_v1  ;;  %v293_v4 = vld [vmem:[%s941_s2 + $0xb0] sm:$0xff]  ;;  %v290_v5 = vld [vmem:[%s941_s2 + $0x98] sm:$0xff]  ;;  %v283_v6 = vld [vmem:[%s941_s2 + $0x60] sm:$0xff]  ;;  %s602_s18 = sshll.u32 %s950_s20, 3  ;;  %s610_s26 = smul.u32 3, %s950_s20  ;;  %vm509_vm9 = vcmask 15360  }
   0xf   : > { %335 = vmatpush.msra.mxu1 %v293_v4  ;;  %v287_v7 = vld [vmem:[%s941_s2 + $0x80] sm:$0xff]  ;;  %v280_v8 = vld [vmem:[%s941_s2 + $0x48] sm:$0xff]  ;;  %v277_v10 = vld [vmem:[%s941_s2 + $0x30] sm:$0xff]  ;;  %s258_s11 = scalar_lea.vmem %s939_s0, %s602_s18  ;;  %s269_s10 = scalar_lea.vmem %s944_s5, %s602_s18 }
  0x10   : > { %316 = vmatpush.msra.mxu2 %v289_v2  ;;  %v284_v9 = vld [vmem:[%s941_s2 + $0x68] sm:$0xff]  ;;  %v391_v11 = vld [vmem:[%s942_s3 + $0x78] sm:$0xff]  ;;  %v390_v12 = vld [vmem:[%s942_s3 + $0x70] sm:$0xff]  ;;  %s262_s6 = scalar_lea.vmem %s940_s1, %s610_s26 }
  0x11   : > { %336 = vmatpush.msra.mxu1 %v290_v5  ;;  %v281_v13 = vld [vmem:[%s941_s2 + $0x50] sm:$0xff]  ;;  %423 = vmatpush.msra.mxu3 %v391_v11  ;;  %v274_v14 = vld [vmem:[%s941_s2 + $0x18] sm:$0xff]  ;;  %v389_v15 = vld [vmem:[%s942_s3 + $0x68] sm:$0xff] }
  0x12   : > { %317 = vmatpush.msra.mxu2 %v286_v3  ;;  %v407_v16 = vld [vmem:[%s942_s3 + $0xf8] sm:$0xff]  ;;  %v406_v18 = vld [vmem:[%s942_s3 + $0xf0] sm:$0xff]  ;;  %v271_v19 = vld [vmem:[%s941_s2] sm:$0xff] }
  0x13   : > { %337 = vmatpush.msra.mxu1 %v287_v7  ;;  %v278_v17 = vld [vmem:[%s941_s2 + $0x38] sm:$0xff]  ;;  %424 = vmatpush.msra.mxu3 %v390_v12  ;;  %v388_v20 = vld [vmem:[%s942_s3 + $0x60] sm:$0xff]  ;;  %v272_v26 = vld [vmem:[%s941_s2 + $0x8] sm:$0xff] }
  0x14   : > { %318 = vmatpush.msra.mxu2 %v283_v6  ;;  %443 = vmatpush.msra.mxu0 %v407_v16  ;;  %v294_v21 = vld [vmem:[%s941_s2 + $0xb8] sm:$0xff]  ;;  %v275_v22 = vld [vmem:[%s941_s2 + $0x20] sm:$0xff]  ;;  %v386_v27 = vld [vmem:[%s942_s3 + $0x50] sm:$0xff] }
  0x15   : > { %338 = vmatpush.msra.mxu1 %v284_v9  ;;  %425 = vmatpush.msra.mxu3 %v389_v15  ;;  %v270_v23 = vld [vmem:[%s258_s11] sm:$0xff]  ;;  %v387_v24 = vld [vmem:[%s942_s3 + $0x58] sm:$0xff]  ;;  %v288_v28 = vld [vmem:[%s941_s2 + $0x88] sm:$0xff] }
  0x16   : > { %319 = vmatpush.msra.mxu2 %v280_v8  ;;  %444 = vmatpush.msra.mxu0 %v406_v18  ;;  %v291_v25 = vld [vmem:[%s941_s2 + $0xa0] sm:$0xff]  ;;  %v405_v29 = vld [vmem:[%s942_s3 + $0xe8] sm:$0xff]  ;;  %v285_v31 = vld [vmem:[%s941_s2 + $0x70] sm:$0xff] }
  0x17   : > { %339 = vmatpush.msra.mxu1 %v281_v13  ;;  %426 = vmatpush.msra.mxu3 %v388_v20  ;;  %v385_v30 = vld [vmem:[%s942_s3 + $0x48] sm:$0xff]  ;;  %v404_v32 = vld [vmem:[%s942_s3 + $0xe0] sm:$0xff]  ;;  %v282_v34 = vld [vmem:[%s941_s2 + $0x58] sm:$0xff] }
  0x18   : > { %320 = vmatpush.msra.mxu2 %v277_v10  ;;  %445 = vmatpush.msra.mxu0 %v405_v29  ;;  %v384_v33 = vld [vmem:[%s942_s3 + $0x40] sm:$0xff]  ;;  %v403_v35 = vld [vmem:[%s942_s3 + $0xd8] sm:$0xff]  ;;  %v402_v38 = vld [vmem:[%s942_s3 + $0xd0] sm:$0xff] }
  0x19   : > { %340 = vmatpush.msra.mxu1 %v278_v17  ;;  %427 = vmatpush.msra.mxu3 %v387_v24  ;;  %v383_v36 = vld [vmem:[%s942_s3 + $0x38] sm:$0xff]  ;;  %v279_v37 = vld [vmem:[%s941_s2 + $0x40] sm:$0xff]  ;;  %v382_v39 = vld [vmem:[%s942_s3 + $0x30] sm:$0xff] }
  0x1a   : > { %321 = vmatpush.msra.mxu2 %v274_v14  ;;  %446 = vmatpush.msra.mxu0 %v404_v32  ;;  %v276_v40 = vld [vmem:[%s941_s2 + $0x28] sm:$0xff]  ;;  %v273_v43 = vld [vmem:[%s941_s2 + $0x10] sm:$0xff]  ;;  %v400_v44 = vld [vmem:[%s942_s3 + $0xc0] sm:$0xff] }
  0x1b   : > { %341 = vmatpush.msra.mxu1 %v275_v22  ;;  %428 = vmatpush.msra.mxu3 %v386_v27  ;;  %v401_v41 = vld [vmem:[%s942_s3 + $0xc8] sm:$0xff]  ;;  %v380_v45 = vld [vmem:[%s942_s3 + $0x20] sm:$0xff]  ;;  %v399_v46 = vld [vmem:[%s942_s3 + $0xb8] sm:$0xff] }
  0x1c   : > { %322 = vmatpush.msra.mxu2 %v271_v19  ;;  %447 = vmatpush.msra.mxu0 %v403_v35  ;;  %v381_v42 = vld [vmem:[%s942_s3 + $0x28] sm:$0xff]  ;;  %v379_v47 = vld [vmem:[%s942_s3 + $0x18] sm:$0xff]  ;;  %v378_v48 = vld [vmem:[%s942_s3 + $0x10] sm:$0xff] }
  0x1d   : > { %604 = vmatmul.msk.f32.vlgmr.msra.gmra.mxu2 %vm303_vm0, %v270_v23  ;;  %342 = vmatpush.msra.mxu1 %v272_v26  ;;  %v398_v49 = vld [vmem:[%s942_s3 + $0xb0] sm:$0xff]  ;;  %v377_v50 = vld [vmem:[%s942_s3 + $0x8] sm:$0xff]  ;;  %v415_v52 = vld [vmem:[%s942_s3 + $0x138] sm:$0xff] }
  0x1e   : > { %355 = vmatpush.msrb.mxu2 %v294_v21  ;;  %605 = vmatmul.msk.f32.vlgmr.msra.gmra.mxu1 %vm303_vm0, %v270_v23  ;;  %v397_v51 = vld [vmem:[%s942_s3 + $0xa8] sm:$0xff]  ;;  %v376_v53 = vld [vmem:[%s942_s3] sm:$0xff]  ;;  %v414_v55 = vld [vmem:[%s942_s3 + $0x130] sm:$0xff] }
  0x1f   : > { %429 = vmatpush.msra.mxu3 %v385_v30  ;;  %448 = vmatpush.msra.mxu0 %v402_v38  ;;  %v396_v54 = vld [vmem:[%s942_s3 + $0xa0] sm:$0xff]  ;;  %v395_v56 = vld [vmem:[%s942_s3 + $0x98] sm:$0xff]  ;;  %v413_v57 = vld [vmem:[%s942_s3 + $0x128] sm:$0xff] }
  0x20   : > { %356 = vmatpush.msrb.mxu2 %v291_v25  ;;  %471 = vmatpush.msrb.mxu1 %v415_v52  ;;  %v394_v58 = vld [vmem:[%s942_s3 + $0x90] sm:$0xff]  ;;  %v412_v59 = vld [vmem:[%s942_s3 + $0x120] sm:$0xff]  ;;  %v411_v60 = vld [vmem:[%s942_s3 + $0x118] sm:$0xff] }
  0x21   : > { %430 = vmatpush.msra.mxu3 %v384_v33  ;;  %449 = vmatpush.msra.mxu0 %v401_v41  ;;  %v393_v61 = vld [vmem:[%s942_s3 + $0x88] sm:$0xff]  ;;  %v392_v62 = vld [vmem:[%s942_s3 + $0x80] sm:$0xff]  ;;  %v410_v63 = vld [vmem:[%s942_s3 + $0x110] sm:$0xff] }
  0x22   : > { %357 = vmatpush.msrb.mxu2 %v288_v28  ;;  %472 = vmatpush.msrb.mxu1 %v414_v55  ;;  %v409_v0 = vld [vmem:[%s942_s3 + $0x108] sm:$0xff]  ;;  %v408_v1 = vld [vmem:[%s942_s3 + $0x100] sm:$0xff] }
  0x23   : > { %431 = vmatpush.msra.mxu3 %v383_v36  ;;  %450 = vmatpush.msra.mxu0 %v400_v44  ;;  %v295_v2 = vld [vmem:[%s262_s6] sm:$0x7] }
  0x24   : > { %358 = vmatpush.msrb.mxu2 %v285_v31  ;;  %473 = vmatpush.msrb.mxu1 %v413_v57  ;;  %v298_v3 = vperm.slane %v295_v2, 1  ;;  %v297_v5 = vperm.slane %v295_v2, 0  ;;  %v299_v13 = vperm.slane %v295_v2, 2  ;;  %v636_v18 = vld [vmem:[#allocation2] ss:$0 sm:$0xff] }
  0x25   : > { %432 = vmatpush.msra.mxu3 %v382_v39  ;;  %451 = vmatpush.msra.mxu0 %v399_v46 }
  0x26   : > { %359 = vmatpush.msrb.mxu2 %v282_v34  ;;  %474 = vmatpush.msrb.mxu1 %v412_v59 }
  0x27   : > { %433 = vmatpush.msra.mxu3 %v381_v42  ;;  %452 = vmatpush.msra.mxu0 %v398_v49 }
  0x28   : > { %360 = vmatpush.msrb.mxu2 %v279_v37  ;;  %475 = vmatpush.msrb.mxu1 %v411_v60 }
  0x29   : > { %434 = vmatpush.msra.mxu3 %v380_v45  ;;  %453 = vmatpush.msra.mxu0 %v397_v51 }
  0x2a   : > { %361 = vmatpush.msrb.mxu2 %v276_v40  ;;  %476 = vmatpush.msrb.mxu1 %v410_v63 }
  0x2b   : > { %435 = vmatpush.msra.mxu3 %v379_v47  ;;  %454 = vmatpush.msra.mxu0 %v396_v54 }
  0x2c   : > { %362 = vmatpush.msrb.mxu2 %v273_v43  ;;  %477 = vmatpush.msrb.mxu1 %v409_v0 }
  0x2d   : > { %606 = vmatmul.msk.f32.vlgmr.msrb.gmra.mxu2 %vm303_vm0, %v270_v23  ;;  %436 = vmatpush.msra.mxu3 %v378_v48 }
  0x2e   : > { %455 = vmatpush.msra.mxu0 %v395_v56  ;;  %478 = vmatpush.msrb.mxu1 %v408_v1 }
  0x2f   : > { %437 = vmatpush.msra.mxu3 %v377_v50 }
  0x30   : > { %456 = vmatpush.msra.mxu0 %v394_v58 }
  0x31   : > { %438 = vmatpush.msra.mxu3 %v376_v53 }
  0x32   : > { %457 = vmatpush.msra.mxu0 %v393_v61 }
  0x34   : > { %458 = vmatpush.msra.mxu0 %v392_v62 }
  0x9b   : > { %v344_v4 = vpop.f32.mrf.mxu1 }
  0x9c   : > { %v345_v6 = vadd.f32 %v344_v4, %v298_v3 }
  0x9e   : > { %vm368_vm1 = vcmp.gt.f32.partialorder %v345_v6, 0.0  ;;  %v371_v7 = vmul.f32 0.01, %v345_v6 }
  0xa0   : > { %v324_v8 = vpop.f32.mrf.mxu2  ;;  %v374_v10 = vsel %vm368_vm1, %v345_v6, %v371_v7 }
  0xa1   : > { %v325_v9 = vadd.f32 %v324_v8, %v297_v5  ;;  %459 = vmatmul.f32.vlgmr.msra.gmra.mxu0 %v374_v10 }
  0xa3   : > { %vm367_vm2 = vcmp.gt.f32.partialorder %v325_v9, 0.0  ;;  %v370_v11 = vmul.f32 0.01, %v325_v9 }
  0xa5   : > { %v373_v12 = vsel %vm367_vm2, %v325_v9, %v370_v11 }
  0xa6   : > { %439 = vmatmul.f32.vlgmr.msra.gmra.mxu3 %v373_v12 }
  0xb0   : > { %v364_v14 = vpop.f32.mrf.mxu2 }
  0xb1   : > { %v365_v15 = vadd.f32 %v364_v14, %v299_v13 }
  0xb3   : > { %vm369_vm3 = vcmp.gt.f32.partialorder %v365_v15, 0.0  ;;  %v372_v16 = vmul.f32 0.01, %v365_v15 }
  0xb5   : > { %v375_v17 = vsel %vm369_vm3, %v365_v15, %v372_v16 }
  0xb6   : > { %607 = vmatmul.msk.f32.vlgmr.msrb.gmra.mxu1 %vm303_vm0, %v375_v17 }
 0x11e   : > { %v460_v21 = vpop.f32.mrf.mxu0 }
 0x129   : > { %v440_v19 = vpop.f32.mrf.mxu3 }
 0x12a   : > { %v441_v20 = vadd.f32 %v636_v18, %v440_v19 }
 0x12c   : > { %v461_v22 = vadd.f32 %v460_v21, %v441_v20 }
 0x133   : > { %v480_v23 = vpop.f32.mrf.mxu1 }
 0x134   : > { %v481_v24 = vadd.f32 %v480_v23, %v461_v22 }
 0x136   : > { %v483_v25 = vsub.f32 0.0, %v481_v24 }
 0x138   : > { %v484_v26 = vmul.f32 1.442695, %v483_v25 }
 0x13a   : > { %637 = vpow2.f32 %v484_v26 }
 0x140   : > { %v638_v27 = vpop.eup %637 }
 0x141   : > { %v486_v28 = vadd.f32 1.0, %v638_v27 }
 0x143   : > { %639 = vrcp.f32 %v486_v28  ;;  %v498_v32 = vand.u32 2147483648, %v486_v28  ;;  %v496_v34 = vand.u32 2147483647, %v486_v28  ;;  %vm492_vm5 = vweird.f32 %v486_v28 }
 0x145   : > { %v499_v36 = vor.u32 1.1754944e-38, %v498_v32  ;;  %vm497_vm7 = vcmp.eq.f32.partialorder %v496_v34, 8.507059e+37 }
 0x149   : > { %v640_v29 = vpop.eup %639 }
 0x14a   : > { %v488_v30 = vmul.f32 %v640_v29, %v486_v28  ;;  %vm493_vm4 = vweird.f32 %v640_v29 }
 0x14b   : > { %vm494_vm6 = vmor %vm492_vm5, %vm493_vm4 }
 0x14c   : > { %v489_v31 = vsub.f32 1.0, %v488_v30 }
 0x14e   : > { %v490_v33 = vmul.f32 %v640_v29, %v489_v31 }
 0x150   : > { %v491_v35 = vadd.f32 %v640_v29, %v490_v33 }
 0x152   : > { %v495_v37 = vsel %vm494_vm6, %v640_v29, %v491_v35 }
 0x153   : > { %v500_v38 = vsel %vm497_vm7, %v499_v36, %v495_v37 }
 0x154   : > { %v502_v39 = vsub.f32 1.0, %v500_v38 }
 0x156   : > { %504 = vrot.lane.b32.xlu0 %v502_v39, %s665_s7 }
 0x1c8   : > { %v505_v40 = vpop.permute.xlu0 %504 }
 0x1c9   : > { %v508_v41 = vsel %vm507_vm8, %v500_v38, %v505_v40 }
 0x1ca   : > { %510 = vst.msk [vmem:[%s269_s10] sm:$0xff] %vm509_vm9, %v508_v41 }
 0x1cb PF: > { %s17_s22 = sadd.s32 1, %s663_s22   ;;  %s945_s20 = smov %s659_s21 }
 0x1cc   : > { %p14_p5 = scmp.ge.s32.totalorder %s17_s22, 4   ;;  %s946_s21 = smov %s948_s4 }
 0x1ce   :  { %16 = sbr.rel (!%p14_p5) target bundleno = 3 (0x3), region = 73 }

</bundles_post_ra>
